<compile_context>
chip_gen: v5e
topology: v5e:2x2
jax: 0.10.0
libtpu: 0.0.40
codegen_flags: <defaults>
</compile_context>

<pallas_src>
import functools

import jax
import jax.numpy as jnp
import numpy as np
from jax.experimental import pallas as pl
from jax.experimental.pallas import tpu as pltpu

_LANE = 128


def dice_kernel(alpha_ref, x_ref, o_ref):
    """alpha_ref: SMEM scalar (1,), x_ref/o_ref: (B, hb) VMEM tiles."""
    x = x_ref[...].astype(jnp.float32)
    b = x.shape[0]

    # mean over batch (dim 0); the full batch is resident in this tile.
    avg = jnp.mean(x, axis=0, keepdims=True)
    diff = x - avg

    # unbiased variance (torch.std default, correction=1).  rsqrt over the
    # (1, hb) variance instead of sqrt + full-tile divide: only hb lanes of
    # EUP work, leaving the EUP for sigmoid's exp/recip.
    var = jnp.sum(diff * diff, axis=0, keepdims=True) / jnp.float32(b - 1)
    inv_std = jax.lax.rsqrt(var)

    p = jax.nn.sigmoid(diff * inv_std)

    # fused blend: x*p + alpha*x*(1-p) == x * (alpha + (1-alpha)*p)
    alpha = alpha_ref[0]
    o_ref[...] = (x * (alpha + (1.0 - alpha) * p)).astype(o_ref.dtype)


def _pick_block_h(B, H, itemsize, block_h, per_buffer_budget=4 << 20):
    """Largest lane-dense column-tile width that (a) keeps one full-batch
    buffer under the VMEM budget and (b) preferably divides H so the last
    tile isn't a masked partial store."""
    budget_hb = max(_LANE, (per_buffer_budget // max(1, B * itemsize)) // _LANE * _LANE)
    target = min(block_h, budget_hb)
    if H <= target:
        return H                      # single full-width block (block == full dims)
    hb = (target // _LANE) * _LANE    # lane-dense
    for cand in range(hb, _LANE - 1, -_LANE):
        if H % cand == 0:
            return cand               # divides H: unmasked, lane-dense stores
    return hb                         # ragged last tile; Pallas pads it (reduction is over B, so still correct)


@functools.partial(jax.jit, static_argnames=("block_h",))
def dice(x, alpha, *, block_h=512):
    """Dice over dim 0 of a 2-D tensor x:(B, H)."""
    B, H = x.shape
    hb = _pick_block_h(B, H, x.dtype.itemsize, block_h)
    grid = (pl.cdiv(H, hb),)

    # TODO(synk): for very large B (full batch per tile over VMEM budget even
    # at hb=128) switch to a two-pass scheme: pass 1 reduces per-column
    # mean/var partials, pass 2 streams x again applying the activation.

    # VMEM: in + out double-buffered (4 tiles) + ~5 f32 temporaries per tile.
    tile_bytes = B * hb * x.dtype.itemsize
    vmem_needed = 4 * tile_bytes + 5 * B * hb * 4 + (2 << 20)
    vmem_limit = int(min(max(vmem_needed, 32 << 20), 64 << 20))  # v7x has 64 MiB/TC

    return pl.pallas_call(
        dice_kernel,
        out_shape=jax.ShapeDtypeStruct((B, H), x.dtype),
        grid=grid,
        in_specs=[
            pl.BlockSpec(memory_space=pltpu.SMEM),            # alpha scalar
            pl.BlockSpec((B, hb), lambda j: (0, j)),          # x tile, full batch resident
        ],
        out_specs=pl.BlockSpec((B, hb), lambda j: (0, j)),
        compiler_params=pltpu.CompilerParams(
            # H tiles are independent; on v7x a grid >= 2 lets both TCs stream.
            dimension_semantics=("parallel",),
            vmem_limit_bytes=vmem_limit,
        ),
    )(alpha, x)


def dice_nd(x, alpha, *, block_h=512):
    """torch Dice reduces only over dim 0, so N-D inputs fold to (B, -1)."""
    if x.ndim == 2:
        return dice(x, alpha, block_h=block_h)
    B = x.shape[0]
    return dice(x.reshape(B, -1), alpha, block_h=block_h).reshape(x.shape)


# ----------------------------- references ----------------------------------
def dice_reference(x, alpha):
    avg = jnp.mean(x, axis=0)
    std = jnp.std(x, axis=0, ddof=1)    # torch.std default is unbiased
    norm_x = (x - avg) / std
    p = jax.nn.sigmoid(norm_x)
    return x * p + alpha[0] * x * (1.0 - p)


def dice_reference_nd(x, alpha):
    B = x.shape[0]
    return dice_reference(x.reshape(B, -1), alpha).reshape(x.shape)


# -------------------- DeepInterestNetwork forward (JAX) ---------------------
# TODO(synk): the embedding gather and the tiny Linear layers (<=200 wide) stay
# as plain XLA ops; only the Dice activation is a Pallas kernel.
def init_din_params(key, vocab, embed_dim=4):
    ks = jax.random.split(key, 6)

    def linear(k, fan_in, fan_out):
        bound = 1.0 / np.sqrt(fan_in)
        kw, kb = jax.random.split(k)
        w = jax.random.uniform(kw, (fan_in, fan_out), jnp.float32, -bound, bound)
        b = jax.random.uniform(kb, (fan_out,), jnp.float32, -bound, bound)
        return w, b

    return {
        "embed": jax.random.normal(ks[0], (vocab, embed_dim), jnp.float32) * 0.1,
        "att_fc1": linear(ks[1], embed_dim * 3, 36),
        "att_fc2": linear(ks[2], 36, 1),
        "mlp_fc1": linear(ks[3], embed_dim * 2, 200),
        "mlp_fc2": linear(ks[4], 200, 80),
        "mlp_fc3": linear(ks[5], 80, 1),
        # Dice alphas match torch.nn.Parameter(torch.zeros((1,)))
        "alpha_att": jnp.zeros((1,), jnp.float32),
        "alpha_mlp1": jnp.zeros((1,), jnp.float32),
        "alpha_mlp2": jnp.zeros((1,), jnp.float32),
    }


def din_forward(params, x_ids, dice_fn):
    mask = (x_ids > 0).astype(jnp.float32)[..., None]                   # (B, F, 1)
    emb = jnp.take(params["embed"], x_ids, axis=0) * mask               # (B, F, E)

    # ActivationUnit
    behaviors = emb[:, :-1]                                             # (B, T, E)
    B, T, E = behaviors.shape
    ads = jnp.broadcast_to(emb[:, -1:], (B, T, E))                      # x[:, [-1]*T]
    p = behaviors * ads
    att_in = jnp.concatenate([behaviors, p, ads], axis=2)               # (B, T, 3E)
    h = att_in @ params["att_fc1"][0] + params["att_fc1"][1]            # (B, T, 36)
    h = dice_fn(h, params["alpha_att"])
    att = h @ params["att_fc2"][0] + params["att_fc2"][1]               # (B, T, 1)

    # DIN head
    weighted = behaviors * att                                          # (B, T, E)
    user_interest = weighted.sum(axis=1)                                # (B, E)
    concated = jnp.concatenate([user_interest, emb[:, -1]], axis=1)     # (B, 2E)
    z = concated @ params["mlp_fc1"][0] + params["mlp_fc1"][1]          # (B, 200)
    z = dice_fn(z, params["alpha_mlp1"])
    z = z @ params["mlp_fc2"][0] + params["mlp_fc2"][1]                 # (B, 80)
    z = dice_fn(z, params["alpha_mlp2"])
    z = z @ params["mlp_fc3"][0] + params["mlp_fc3"][1]                 # (B, 1)
    return jax.nn.sigmoid(z)


if __name__ == "__main__":
    key = jax.random.PRNGKey(0)
    k_dice, k_din = jax.random.split(key)

    # 1) standalone Dice kernel check (small shapes; second case exercises the
    #    multi-tile grid with lane-dense 128-wide blocks).
    for (B, H, bh) in [(8, 32, 512), (8, 256, 128)]:
        x = jax.random.normal(jax.random.fold_in(k_dice, H), (B, H), jnp.float32)
        alpha = jnp.zeros((1,), jnp.float32)
        out = dice(x, alpha, block_h=bh)
        jax.block_until_ready(out)
        np.testing.assert_allclose(
            np.asarray(out), np.asarray(dice_reference(x, alpha)),
            rtol=1e-5, atol=1e-5)

    # 2) full DeepInterestNetwork forward with the Pallas Dice inside.
    batch, num_fields, embed_dim, vocab = 2, 8, 4, 16
    # Deterministic ids; the two batch rows differ element-wise so no feature
    # column is constant over the batch (unbiased std==0 -> NaN, as in torch).
    f = jnp.arange(num_fields, dtype=jnp.int32)
    x_ids = jnp.stack([(f % (vocab - 1)) + 1, ((f + 5) % (vocab - 1)) + 1])
    x_ids = x_ids.at[0, 2].set(0)            # one padding id to exercise the mask

    params = init_din_params(k_din, vocab, embed_dim)

    out = din_forward(params, x_ids, dice_nd)
    jax.block_until_ready(out)
    ref = din_forward(params, x_ids, dice_reference_nd)
    np.testing.assert_allclose(np.asarray(out), np.asarray(ref),
                               rtol=1e-4, atol=1e-5)
    assert out.shape == (batch, 1)

    print("KERNEL_OK")
</pallas_src>

<mosaic_0001>
module attributes {stable_mosaic.version = 11 : i64} {
  func.func @dice_kernel(%arg0: i32, %arg1: memref<1xf32, #tpu.memory_space<smem>>, %arg2: memref<8x32xf32, #tpu.memory_space<vmem>>, %arg3: memref<8x32xf32, #tpu.memory_space<vmem>>) attributes {dimension_semantics = [#tpu.dimension_semantics<parallel>], iteration_bounds = array<i64: 1>, scalar_prefetch = 0 : i64, scratch_operands = 0 : i64, tpu.core_type = #tpu.core_type<tc>, window_params = [{transform_indices = @transform_0, window_bounds = array<i64: 1>}, {transform_indices = @transform_1, window_bounds = array<i64: 8, 32>}, {transform_indices = @transform_2, window_bounds = array<i64: 8, 32>}]} {
    %c0 = arith.constant 0 : index
    %c0_0 = arith.constant 0 : index
    %0 = vector.load %arg2[%c0, %c0_0] : memref<8x32xf32, #tpu.memory_space<vmem>>, vector<8x32xf32>
    %cst = arith.constant dense<0.000000e+00> : vector<32xf32>
    %1 = vector.multi_reduction <add>, %0, %cst [0] : vector<8x32xf32> to vector<32xf32>
    %2 = vector.shape_cast %1 : vector<32xf32> to vector<1x32xf32>
    %cst_1 = arith.constant 8.000000e+00 : f32
    %3 = vector.broadcast %cst_1 : f32 to vector<1x32xf32>
    %4 = arith.divf %2, %3 : vector<1x32xf32>
    %5 = vector.broadcast %4 : vector<1x32xf32> to vector<8x32xf32>
    %6 = arith.subf %0, %5 : vector<8x32xf32>
    %7 = arith.mulf %6, %6 : vector<8x32xf32>
    %cst_2 = arith.constant dense<0.000000e+00> : vector<32xf32>
    %8 = vector.multi_reduction <add>, %7, %cst_2 [0] : vector<8x32xf32> to vector<32xf32>
    %9 = vector.shape_cast %8 : vector<32xf32> to vector<1x32xf32>
    %cst_3 = arith.constant 7.000000e+00 : f32
    %10 = vector.broadcast %cst_3 : f32 to vector<1x32xf32>
    %11 = arith.divf %9, %10 : vector<1x32xf32>
    %12 = math.rsqrt %11 : vector<1x32xf32>
    %13 = vector.broadcast %12 : vector<1x32xf32> to vector<8x32xf32>
    %14 = arith.mulf %6, %13 : vector<8x32xf32>
    %15 = arith.negf %14 : vector<8x32xf32>
    %16 = math.exp %15 : vector<8x32xf32>
    %cst_4 = arith.constant 1.000000e+00 : f32
    %17 = vector.broadcast %cst_4 : f32 to vector<8x32xf32>
    %18 = arith.addf %17, %16 : vector<8x32xf32>
    %19 = arith.divf %17, %18 : vector<8x32xf32>
    %c0_5 = arith.constant 0 : index
    %20 = memref.load %arg1[%c0_5] : memref<1xf32, #tpu.memory_space<smem>>
    %cst_6 = arith.constant 1.000000e+00 : f32
    %21 = arith.subf %cst_6, %20 : f32
    %22 = vector.broadcast %21 : f32 to vector<8x32xf32>
    %23 = arith.mulf %22, %19 : vector<8x32xf32>
    %24 = vector.broadcast %20 : f32 to vector<8x32xf32>
    %25 = arith.addf %24, %23 : vector<8x32xf32>
    %26 = arith.mulf %0, %25 : vector<8x32xf32>
    %c0_7 = arith.constant 0 : index
    %c0_8 = arith.constant 0 : index
    %27 = vector.load %arg3[%c0_7, %c0_8] : memref<8x32xf32, #tpu.memory_space<vmem>>, vector<8x32xf32>
    tpu.vector_store %arg3[%c0_7, %c0_8], %26 {strides = array<i32>} : memref<8x32xf32, #tpu.memory_space<vmem>>, vector<8x32xf32>,
    return
  }
  func.func @transform_0(%arg0: i32) -> i32 {
    %c0_i32 = arith.constant 0 : i32
    %c0_i32_0 = arith.constant 0 : i32
    return %c0_i32 : i32
  }
  func.func @transform_1(%arg0: i32) -> (i32, i32) {
    %c0_i32 = arith.constant 0 : i32
    %c0_i32_0 = arith.constant 0 : i32
    return %c0_i32, %arg0 : i32, i32
  }
  func.func @transform_2(%arg0: i32) -> (i32, i32) {
    %c0_i32 = arith.constant 0 : i32
    %c0_i32_0 = arith.constant 0 : i32
    return %c0_i32, %arg0 : i32, i32
  }
}

</mosaic_0001>

<bundles_post_ra>
// kernel: dice.1
= control target key start
LH: loop header
LB: loop body
LE: loop exit
PB: predicated region body
PF: predicated region fallthrough
CT: control target
= control target key end

     0   :  { %8 = vsyncpa [#allocation4], 0  ;;  %s222_s0 = inlined_call_operand.<no memory space> [shape: f32[1], index: 0, kind: input, shape index: {}]   ;;  %s223_s1 = inlined_call_operand.hbm [shape: f32[8,32], index: 1, kind: input, shape index: {}]   ;;  %s224_s2 = inlined_call_operand.hbm [shape: f32[8,32], index: 2, kind: output, shape index: {}]  }
   0x1   :  { %9 = vsyncpa [#allocation5], 0  ;;  %s17_s11 = sshll.u32 %s223_s1, 4  ;;  %s183_s12 = smov [#allocation3]   ;;  %s18_s11 = int_to_ptr.hbm [resolvable:$true] %s17_s11 }
   0x2   :  { %s19_s13 = sshll.u32 %s183_s12, 4  ;;  %s20_s13 = int_to_ptr.vmem [resolvable:$true] %s19_s13 }
   0x3   :  { %22 = dma.hbm_to_vmem [thread:$0]  %s18_s11, 128, %s20_s13, [#allocation4]  }
   0x4   :  { %179 = dma.done.wait [#allocation4], 128  }
   0x5   :  { %180 = vsyncadd [#allocation4], 4294967168  ;;  %v184_v0 = vmov 8.0   ;;  %vm28_vm0 = vcmask 261120   ;;  %v205_v2 = vld [vmem:[#allocation3] sm:$0xff]  ;;  %v185_v9 = vmov 7.0   ;;  %v95_v55 = vstv %s222_s0 }
   0x6   :  { %121 = vrcp.f32 %v184_v0  ;;  %v29_v3 = vsel %vm28_vm0, %v205_v2, 0.0  ;;  %s92_s15 = ssub.f32 1.0, %s222_s0  ;;  %s186_s18 = smov [#allocation6]  }
   0x7   :  { %v30_v5 = vrot.slane %v29_v3, 4  ;;  %123 = vrcp.f32 %v185_v9  ;;  %s104_s19 = sshll.u32 %s186_s18, 4  ;;  %s106_s22 = sshll.u32 %s224_s2, 4  ;;  %s105_s19 = int_to_ptr.vmem [resolvable:$true] %s104_s19  ;;  %s107_s22 = int_to_ptr.hbm [resolvable:$true] %s106_s22 }
   0x8   :  { %v93_v52 = vstv %s92_s15 }
   0x9   :  { %v31_v7 = vadd.f32 %v30_v5, %v29_v3 }
   0xb   :  { %v32_v10 = vrot.slane %v31_v7, 2 }
   0xc   :  { %v122_v1 = vpop.eup %121 }
   0xd   :  { %v37_v4 = vmul.f32 8.0, %v122_v1  ;;  %v33_v12 = vadd.f32 %v32_v10, %v31_v7  ;;  %vm41_vm1 = vweird.f32 %v122_v1  ;;  %v124_v14 = vpop.eup %123 }
   0xe   :  { %v54_v18 = vmul.f32 7.0, %v124_v14  ;;  %vm58_vm2 = vweird.f32 %v124_v14 }
   0xf   :  { %v38_v6 = vsub.f32 1.0, %v37_v4  ;;  %v34_v13 = vrot.slane %v33_v12, 1 }
  0x10   :  { %v55_v21 = vsub.f32 1.0, %v54_v18 }
  0x11   :  { %v39_v8 = vmul.f32 %v122_v1, %v38_v6  ;;  %v35_v16 = vadd.f32 %v34_v13, %v33_v12 }
  0x12   :  { %v56_v24 = vmul.f32 %v124_v14, %v55_v21 }
  0x13   :  { %v40_v11 = vadd.f32 %v122_v1, %v39_v8 }
  0x14   :  { %v57_v27 = vadd.f32 %v124_v14, %v56_v24 }
  0x15   :  { %v42_v15 = vsel %vm41_vm1, %v122_v1, %v40_v11 }
  0x16   :  { %v43_v17 = vmul.f32 %v42_v15, %v35_v16  ;;  %v59_v30 = vsel %vm58_vm2, %v124_v14, %v57_v27 }
  0x18   :  { %v44_v19 = vsub.f32 %v205_v2, %v43_v17 }
  0x1a   :  { %v45_v20 = vmul.f32 %v44_v19, %v44_v19 }
  0x1c   :  { %v46_v22 = vsel %vm28_vm0, %v45_v20, 0.0 }
  0x1d   :  { %v47_v23 = vrot.slane %v46_v22, 4 }
  0x1f   :  { %v48_v25 = vadd.f32 %v47_v23, %v46_v22 }
  0x21   :  { %v49_v26 = vrot.slane %v48_v25, 2 }
  0x23   :  { %v50_v28 = vadd.f32 %v49_v26, %v48_v25 }
  0x25   :  { %v51_v29 = vrot.slane %v50_v28, 1 }
  0x27   :  { %v52_v31 = vadd.f32 %v51_v29, %v50_v28 }
  0x29   :  { %v60_v32 = vmul.f32 %v59_v30, %v52_v31 }
  0x2b   :  { %125 = vrsqrt.f32 %v60_v32  ;;  %vm67_vm3 = vweird.f32 %v60_v32 }
  0x31   :  { %v126_v33 = vpop.eup %125 }
  0x32   :  { %v62_v34 = vmul.f32 %v126_v33, %v60_v32  ;;  %vm68_vm4 = vweird.f32 %v126_v33 }
  0x33   :  { %vm69_vm5 = vmor %vm67_vm3, %vm68_vm4 }
  0x34   :  { %v63_v35 = vmul.f32 %v126_v33, %v62_v34 }
  0x36   :  { %v64_v36 = vmul.f32 0.5, %v63_v35 }
  0x38   :  { %v65_v37 = vsub.f32 1.5, %v64_v36 }
  0x3a   :  { %v66_v38 = vmul.f32 %v126_v33, %v65_v37 }
  0x3c   :  { %v70_v39 = vsel %vm69_vm5, %v126_v33, %v66_v38 }
  0x3d   :  { %v71_v40 = vmul.f32 %v70_v39, %v44_v19 }
  0x3f   :  { %v116_v41 = vmul.f32 -1.442695, %v71_v40 }
  0x41   :  { %127 = vpow2.f32 %v116_v41 }
  0x47   :  { %v128_v42 = vpop.eup %127 }
  0x48   :  { %v75_v43 = vadd.f32 1.0, %v128_v42 }
  0x4a   :  { %129 = vrcp.f32 %v75_v43  ;;  %v87_v46 = vand.u32 2147483648, %v75_v43  ;;  %vm81_vm6 = vweird.f32 %v75_v43  ;;  %v85_v48 = vand.u32 2147483647, %v75_v43 }
  0x4c   :  { %v88_v50 = vor.u32 1.1754944e-38, %v87_v46  ;;  %vm86_vm9 = vcmp.eq.f32.partialorder %v85_v48, 8.507059e+37 }
  0x50   :  { %v130_v44 = vpop.eup %129 }
  0x51   :  { %v77_v45 = vmul.f32 %v130_v44, %v75_v43  ;;  %vm82_vm7 = vweird.f32 %v130_v44 }
  0x52   :  { %vm83_vm8 = vmor %vm81_vm6, %vm82_vm7 }
  0x53   :  { %v78_v47 = vsub.f32 1.0, %v77_v45 }
  0x55   :  { %v79_v49 = vmul.f32 %v130_v44, %v78_v47 }
  0x57   :  { %v80_v51 = vadd.f32 %v130_v44, %v79_v49 }
  0x59   :  { %v84_v53 = vsel %vm83_vm8, %v130_v44, %v80_v51 }
  0x5a   :  { %v89_v54 = vsel %vm86_vm9, %v88_v50, %v84_v53 }
  0x5b   :  { %v94_v56 = vmul.f32 %v93_v52, %v89_v54 }
  0x5d   :  { %v96_v57 = vadd.f32 %v95_v55, %v94_v56 }
  0x5f   :  { %v97_v58 = vmul.f32 %v96_v57, %v205_v2 }
  0x61   :  { %98 = vst.msk [vmem:[#allocation6] sm:$0xff] %vm28_vm0, %v97_v58 }
  0x62   :  { %109 = dma.vmem_to_hbm [thread:$0]  %s105_s19, 128, %s107_s22, [#allocation5]  }
  0x63   :  { %181 = dma.done.wait [#allocation5], 128  }
  0x64   :  { %182 = vsyncadd [#allocation5], 4294967168 }
  0x65   :  { %114 = vsyncpa [#allocation4], 1 }
  0x66   :  { %115 = vsyncpa [#allocation5], 1 }

</bundles_post_ra>
